<compile_context>
chip_gen: v7x
topology: tpu7x:2x2x1
jax: 0.10.0
libtpu: 0.0.40
codegen_flags: <defaults>
</compile_context>

<pallas_src>
import math

import jax
import jax.numpy as jnp
from jax.experimental import pallas as pl
from jax.experimental.pallas import tpu as pltpu

d_model = 512
MAX_LEN = 5000  # matches the PyTorch module default


def make_pe_table(max_len, dm, dtype=jnp.float32):
    """Same table as the PyTorch buffer `pe` (before the unsqueeze/transpose)."""
    position = jnp.arange(max_len, dtype=jnp.float32)[:, None]
    div_term = jnp.exp(
        jnp.arange(0, dm, 2, dtype=jnp.float32) * (-math.log(10000.0) / dm))
    pe = jnp.zeros((max_len, dm), dtype=jnp.float32)
    pe = pe.at[:, 0::2].set(jnp.sin(position * div_term))
    pe = pe.at[:, 1::2].set(jnp.cos(position * div_term))
    return pe.astype(dtype)


# ------------------------------- kernel body ---------------------------------
def _pos_enc_kernel(x_ref, pe_ref, o_ref):
    # x_ref:  [TS, B, D]   pe_ref: [TS, 1, D]   o_ref: [TS, B, D]
    # Broadcast-add over the batch (sublane) axis; pure VPU work, lane-dense
    # (D = 512 = 4 * 128) so loads/stores are full-width, unmasked.
    o_ref[...] = x_ref[...] + pe_ref[...]


# ------------------------------ pallas wrapper --------------------------------
def positional_encoding(x, pe_table, *, seq_tile=256):
    """Eval-mode PositionalEncoding.forward: x + pe[:seq_len]; dropout = identity.

    x:        [seq_len, batch, d_model]  (same layout as the PyTorch module)
    pe_table: [max_len, d_model]
    """
    S, B, D = x.shape
    assert D == pe_table.shape[1]

    # Slice the table to the active sequence length and give it a singleton
    # batch axis so the kernel broadcast is a plain same-rank VPU add.
    pe = jax.lax.slice(pe_table, (0, 0), (S, D)).astype(x.dtype)[:, None, :]

    ts = min(seq_tile, S)
    grid = (pl.cdiv(S, ts),)

    return pl.pallas_call(
        _pos_enc_kernel,
        out_shape=jax.ShapeDtypeStruct((S, B, D), x.dtype),
        grid=grid,
        in_specs=[
            pl.BlockSpec((ts, B, D), lambda i: (i, 0, 0)),
            pl.BlockSpec((ts, 1, D), lambda i: (i, 0, 0)),
        ],
        out_specs=pl.BlockSpec((ts, B, D), lambda i: (i, 0, 0)),
        compiler_params=pltpu.CompilerParams(
            # Independent seq tiles -> shardable across v7x's 2 TensorCores;
            # no effect (but harmless) on single-TC v5e/v6e.
            dimension_semantics=("parallel",),
        ),
    )(x, pe)


# ----------------------------------- main -------------------------------------
if __name__ == "__main__":
    key = jax.random.PRNGKey(0)

    seq_len, batch = 8, 2
    x = jax.random.normal(key, (seq_len, batch, d_model), jnp.float32)
    pe_table = make_pe_table(MAX_LEN, d_model)

    out = positional_encoding(x, pe_table)
    out = jax.block_until_ready(out)

    # Pure-JAX reference of the module's forward (eval mode: dropout = identity).
    ref = x + pe_table[:seq_len][:, None, :]

    assert out.shape == (seq_len, batch, d_model)
    assert out.dtype == x.dtype
    assert bool(jnp.all(jnp.isfinite(out)))
    assert bool(jnp.allclose(out, ref, atol=1e-6, rtol=1e-6))

    print("KERNEL_OK")
</pallas_src>

<mosaic_0001>
module attributes {stable_mosaic.version = 11 : i64} {
  func.func @_pos_enc_kernel(%arg0: i32, %arg1: memref<8x2x512xf32, #tpu.memory_space<vmem>>, %arg2: memref<8x1x512xf32, #tpu.memory_space<vmem>>, %arg3: memref<8x2x512xf32, #tpu.memory_space<vmem>>) attributes {dimension_semantics = [#tpu.dimension_semantics<parallel>], iteration_bounds = array<i64: 1>, scalar_prefetch = 0 : i64, scratch_operands = 0 : i64, tpu.core_type = #tpu.core_type<tc>, window_params = [{transform_indices = @transform_0, window_bounds = array<i64: 8, 2, 512>}, {transform_indices = @transform_1, window_bounds = array<i64: 8, 1, 512>}, {transform_indices = @transform_2, window_bounds = array<i64: 8, 2, 512>}]} {
    %c0 = arith.constant 0 : index
    %c0_0 = arith.constant 0 : index
    %c0_1 = arith.constant 0 : index
    %0 = vector.load %arg1[%c0, %c0_0, %c0_1] : memref<8x2x512xf32, #tpu.memory_space<vmem>>, vector<8x2x512xf32>
    %c0_2 = arith.constant 0 : index
    %c0_3 = arith.constant 0 : index
    %c0_4 = arith.constant 0 : index
    %1 = vector.load %arg2[%c0_2, %c0_3, %c0_4] : memref<8x1x512xf32, #tpu.memory_space<vmem>>, vector<8x1x512xf32>
    %2 = vector.broadcast %1 : vector<8x1x512xf32> to vector<8x2x512xf32>
    %3 = arith.addf %0, %2 : vector<8x2x512xf32>
    %c0_5 = arith.constant 0 : index
    %c0_6 = arith.constant 0 : index
    %c0_7 = arith.constant 0 : index
    %4 = vector.load %arg3[%c0_5, %c0_6, %c0_7] : memref<8x2x512xf32, #tpu.memory_space<vmem>>, vector<8x2x512xf32>
    tpu.vector_store %arg3[%c0_5, %c0_6, %c0_7], %3 {strides = array<i32>} : memref<8x2x512xf32, #tpu.memory_space<vmem>>, vector<8x2x512xf32>,
    return
  }
  func.func @transform_0(%arg0: i32) -> (i32, i32, i32) {
    %c0_i32 = arith.constant 0 : i32
    %c0_i32_0 = arith.constant 0 : i32
    %c0_i32_1 = arith.constant 0 : i32
    return %arg0, %c0_i32, %c0_i32_0 : i32, i32, i32
  }
  func.func @transform_1(%arg0: i32) -> (i32, i32, i32) {
    %c0_i32 = arith.constant 0 : i32
    %c0_i32_0 = arith.constant 0 : i32
    %c0_i32_1 = arith.constant 0 : i32
    return %arg0, %c0_i32, %c0_i32_0 : i32, i32, i32
  }
  func.func @transform_2(%arg0: i32) -> (i32, i32, i32) {
    %c0_i32 = arith.constant 0 : i32
    %c0_i32_0 = arith.constant 0 : i32
    %c0_i32_1 = arith.constant 0 : i32
    return %arg0, %c0_i32, %c0_i32_0 : i32, i32, i32
  }
}

</mosaic_0001>

<bundles_post_ra>
// kernel: tpu_custom_call.1
= control target key start
LH: loop header
LB: loop body
LE: loop exit
PB: predicated region body
PF: predicated region fallthrough
CT: control target
= control target key end

     0   :  { %7 = vsyncpa [#allocation3], 0  ;;  %s573_s0 = inlined_call_operand.hbm [shape: f32[8,2,512], index: 0, kind: input, shape index: {}]   ;;  %s574_s1 = inlined_call_operand.hbm [shape: f32[8,1,512], index: 1, kind: input, shape index: {}]   ;;  %s575_s2 = inlined_call_operand.hbm [shape: f32[8,2,512], index: 2, kind: output, shape index: {}]  }
   0x1   :  { %8 = vsyncpa [#allocation6], 0 }
   0x2   :  { %9 = vsyncpa [#allocation4], 0  ;;  %s450_s9 = smov [#allocation2]   ;;  %s378_s13 = scalar_lea.hbm %s573_s0, 1024 }
   0x3   :  { %s15_s10 = sshll.u32 %s450_s9, 4  ;;  %p379_p0 = scmp.ne.s32.totalorder %s573_s0, %s378_s13  ;;  %s16_s10 = int_to_ptr.vmem [resolvable:$true] %s15_s10 }
   0x4   :  { %p382_p1 = scmp.lt.u32.totalorder %s378_s13, %s573_s0 }
   0x6   :  { %p384_p2 = pnand %p382_p1, %p379_p0 }
   0x8   :  { %387 = shalt.err (!%p384_p2)
}
   0x9   :  { %s388_s18 = scalar_lea.vmem %s16_s10, 1024  ;;  %p393_p4 = scmp.lt.s32.totalorder %s16_s10, %s16_s10 }
   0xa   :  { %p389_p3 = scmp.ne.s32.totalorder %s16_s10, %s388_s18  ;;  %p394_p5 = scmp.lt.s32.totalorder %s388_s18, %s388_s18 }
   0xc   :  { %p395_p6 = por %p394_p5, %p393_p4 }
   0xe   :  { %p396_p7 = pnand %p395_p6, %p389_p3 }
  0x10   :  { %399 = shalt.err (!%p396_p7)
}
  0x11   :  { %s451_s19 = smov 128   ;;  %s452_s20 = smov 8  }
  0x12   :  { %21 = dma.hbm_to_vmem [thread:$0]  %s573_s0, 1024, %s16_s10, [#allocation3], %s451_s19, %s451_s19, %s452_s20  }
  0x13   :  { %s453_s23 = smov [#allocation5]   ;;  %s400_s27 = scalar_lea.hbm %s574_s1, 512 }
  0x14   :  { %s27_s24 = sshll.u32 %s453_s23, 4  ;;  %p401_p8 = scmp.ne.s32.totalorder %s574_s1, %s400_s27  ;;  %s28_s24 = int_to_ptr.vmem [resolvable:$true] %s27_s24 }
  0x15   :  { %p404_p9 = scmp.lt.u32.totalorder %s400_s27, %s574_s1 }
  0x17   :  { %p406_p10 = pnand %p404_p9, %p401_p8 }
  0x19   :  { %409 = shalt.err (!%p406_p10)
}
  0x1a   :  { %s410_s4 = scalar_lea.vmem %s28_s24, 512  ;;  %p415_p12 = scmp.lt.s32.totalorder %s28_s24, %s28_s24 }
  0x1b   :  { %p411_p11 = scmp.ne.s32.totalorder %s28_s24, %s410_s4  ;;  %p416_p13 = scmp.lt.s32.totalorder %s410_s4, %s410_s4 }
  0x1d   :  { %p417_p0 = por %p416_p13, %p415_p12 }
  0x1f   :  { %p418_p1 = pnand %p417_p0, %p411_p11 }
  0x21   :  { %421 = shalt.err (!%p418_p1)
}
  0x22   :  { %s454_s0 = smov 64   ;;  %s455_s5 = smov 4  }
  0x23   :  { %33 = dma.hbm_to_vmem [thread:$0]  %s574_s1, 512, %s28_s24, [#allocation6], %s454_s0, %s454_s0, %s455_s5  }
  0x24   :  { %444 = dma.done.wait [#allocation3], 1024  }
  0x25   :  { %445 = vsyncadd [#allocation3], 4294966272 }
  0x26   :  { %446 = dma.done.wait [#allocation6], 512  }
  0x27   :  { %447 = vsyncadd [#allocation6], 4294966784  ;;  %v64_v0 = vlaneseq  ;;  %v456_v1 = vmov 1983009808   ;;  %v48_v9 = vld [vmem:[#allocation5] sm:$0xf] }
  0x28   :  { %v195_v2 = vunpack.c.l.s4 %v456_v1  ;;  %v49_v15 = vld [vmem:[#allocation5 + $0x4] sm:$0xf]  ;;  %v50_v16 = vld [vmem:[#allocation5 + $0x8] sm:$0xf]  ;;  %v51_v21 = vld [vmem:[#allocation5 + $0xc] sm:$0xf] }
  0x29   :  { %v65_v3 = vshrl.u32 %v64_v0, 7  ;;  %v52_v34 = vld [vmem:[#allocation5 + $0x10] sm:$0xf]  ;;  %v40_v35 = vld [vmem:[#allocation2] sm:$0xff]  ;;  %v41_v41 = vld [vmem:[#allocation2 + $0x8] sm:$0xff]  ;;  %s457_s1 = smov [#allocation7]  }
  0x2a   :  { %v196_v4 = vunpack.c.0.s8 %v195_v2  ;;  %v53_v49 = vld [vmem:[#allocation5 + $0x14] sm:$0xf]  ;;  %v54_v59 = vld [vmem:[#allocation5 + $0x18] sm:$0xf]  ;;  %s357_s8 = sshll.u32 %s457_s1, 4  ;;  %s358_s8 = int_to_ptr.vmem [resolvable:$true] %s357_s8 }
  0x2b   :  { %v500_v5 = vsub.s32 0, %v65_v3  ;;  %v502_v6 = vsub.s32 1, %v65_v3  ;;  %v504_v7 = vsub.s32 2, %v65_v3  ;;  %v506_v8 = vsub.s32 3, %v65_v3  ;;  %v42_v51 = vld [vmem:[#allocation2 + $0x10] sm:$0xff]  ;;  %v43_v1 = vld [vmem:[#allocation2 + $0x18] sm:$0xff]  ;;  %p427_p3 = scmp.lt.s32.totalorder %s358_s8, %s358_s8 }
  0x2c   :  { %v508_v10 = vsub.s32 %v196_v4, %v65_v3  ;;  %s422_s9 = scalar_lea.vmem %s358_s8, 1024 }
  0x2d   :  { %v67_v11 = vrot.slane %v48_v9, %v500_v5  ;;  %v71_v12 = vrot.slane %v48_v9, %v502_v6  ;;  %v75_v13 = vrot.slane %v48_v9, %v504_v7  ;;  %v79_v14 = vrot.slane %v48_v9, %v506_v8  ;;  %v55_v9 = vld [vmem:[#allocation5 + $0x1c] sm:$0xf]  ;;  %p423_p2 = scmp.ne.s32.totalorder %s358_s8, %s422_s9  ;;  %p428_p4 = scmp.lt.s32.totalorder %s422_s9, %s422_s9 }
  0x2e   :  { %v83_v17 = vrot.slane %v49_v15, %v500_v5  ;;  %v87_v18 = vrot.slane %v49_v15, %v502_v6  ;;  %v91_v19 = vrot.slane %v49_v15, %v504_v7  ;;  %v95_v20 = vrot.slane %v49_v15, %v506_v8 }
  0x2f   :  { %v192_v22 = vcombine.low %v67_v11, %v71_v12  ;;  %v193_v23 = vcombine.low %v75_v13, %v79_v14  ;;  %v99_v24 = vrot.slane %v50_v16, %v500_v5  ;;  %v103_v25 = vrot.slane %v50_v16, %v502_v6  ;;  %p429_p5 = por %p428_p4, %p427_p3 }
  0x30   :  { %v209_v26 = vcombine.low %v83_v17, %v87_v18  ;;  %v210_v27 = vcombine.low %v91_v19, %v95_v20  ;;  %v107_v28 = vrot.slane %v50_v16, %v504_v7  ;;  %v111_v29 = vrot.slane %v50_v16, %v506_v8  ;;  %v44_v20 = vld [vmem:[#allocation2 + $0x20] sm:$0xff] }
  0x31   :  { %v200_v30 = vrot.slane %v192_v22, %v508_v10  ;;  %v207_v31 = vrot.slane %v193_v23, %v508_v10  ;;  %v226_v32 = vcombine.low %v99_v24, %v103_v25  ;;  %v115_v33 = vrot.slane %v51_v21, %v500_v5  ;;  %p430_p6 = pnand %p429_p5, %p423_p2 }
  0x32   :  { %v217_v36 = vrot.slane %v209_v26, %v508_v10  ;;  %v224_v37 = vrot.slane %v210_v27, %v508_v10  ;;  %v227_v38 = vcombine.low %v107_v28, %v111_v29  ;;  %v119_v39 = vrot.slane %v51_v21, %v502_v6  ;;  %v45_v28 = vld [vmem:[#allocation2 + $0x28] sm:$0xff] }
  0x33   :  { %v208_v40 = vcombine.low %v200_v30, %v207_v31  ;;  %v234_v42 = vrot.slane %v226_v32, %v508_v10  ;;  %v123_v43 = vrot.slane %v51_v21, %v504_v7  ;;  %v127_v44 = vrot.slane %v51_v21, %v506_v8 }
  0x34   :  { %v225_v45 = vcombine.low %v217_v36, %v224_v37  ;;  %v241_v46 = vrot.slane %v227_v38, %v508_v10  ;;  %v243_v47 = vcombine.low %v115_v33, %v119_v39  ;;  %v131_v48 = vrot.slane %v52_v34, %v500_v5  ;;  %v46_v38 = vld [vmem:[#allocation2 + $0x30] sm:$0xff] }
  0x35   :  { %v336_v50 = vadd.f32 %v208_v40, %v40_v35  ;;  %v244_v52 = vcombine.low %v123_v43, %v127_v44  ;;  %v135_v53 = vrot.slane %v52_v34, %v502_v6  ;;  %v139_v54 = vrot.slane %v52_v34, %v504_v7 }
  0x36   :  { %v337_v55 = vadd.f32 %v225_v45, %v41_v41  ;;  %v242_v56 = vcombine.low %v234_v42, %v241_v46  ;;  %v251_v57 = vrot.slane %v243_v47, %v508_v10  ;;  %v143_v58 = vrot.slane %v52_v34, %v506_v8 }
  0x37   :  { %344 = vst [vmem:[#allocation7] sm:$0xff] %v336_v50  ;;  %v258_v60 = vrot.slane %v244_v52, %v508_v10  ;;  %v260_v61 = vcombine.low %v131_v48, %v135_v53  ;;  %v147_v62 = vrot.slane %v53_v49, %v500_v5  ;;  %v151_v63 = vrot.slane %v53_v49, %v502_v6 }
  0x38   :  { %345 = vst [vmem:[#allocation7 + $0x8] sm:$0xff] %v337_v55  ;;  %v338_v0 = vadd.f32 %v242_v56, %v42_v51  ;;  %v261_v2 = vcombine.low %v139_v54, %v143_v58  ;;  %v155_v3 = vrot.slane %v53_v49, %v504_v7  ;;  %v159_v4 = vrot.slane %v53_v49, %v506_v8 }
  0x39   :  { %v259_v11 = vcombine.low %v251_v57, %v258_v60  ;;  %v268_v12 = vrot.slane %v260_v61, %v508_v10  ;;  %v277_v13 = vcombine.low %v147_v62, %v151_v63  ;;  %v163_v14 = vrot.slane %v54_v59, %v500_v5 }
  0x3a   :  { %346 = vst [vmem:[#allocation7 + $0x10] sm:$0xff] %v338_v0  ;;  %v275_v15 = vrot.slane %v261_v2, %v508_v10  ;;  %v278_v16 = vcombine.low %v155_v3, %v159_v4  ;;  %v167_v17 = vrot.slane %v54_v59, %v502_v6  ;;  %v171_v18 = vrot.slane %v54_v59, %v504_v7 }
  0x3b   :  { %v339_v19 = vadd.f32 %v259_v11, %v43_v1  ;;  %v285_v21 = vrot.slane %v277_v13, %v508_v10  ;;  %v175_v22 = vrot.slane %v54_v59, %v506_v8  ;;  %v179_v23 = vrot.slane %v55_v9, %v500_v5 }
  0x3c   :  { %v276_v24 = vcombine.low %v268_v12, %v275_v15  ;;  %v292_v25 = vrot.slane %v278_v16, %v508_v10  ;;  %v294_v26 = vcombine.low %v163_v14, %v167_v17  ;;  %v183_v27 = vrot.slane %v55_v9, %v502_v6 }
  0x3d   :  { %347 = vst [vmem:[#allocation7 + $0x18] sm:$0xff] %v339_v19  ;;  %v295_v29 = vcombine.low %v171_v18, %v175_v22  ;;  %v187_v30 = vrot.slane %v55_v9, %v504_v7  ;;  %v191_v31 = vrot.slane %v55_v9, %v506_v8  ;;  %v47_v7 = vld [vmem:[#allocation2 + $0x38] sm:$0xff] }
  0x3e   :  { %v340_v32 = vadd.f32 %v276_v24, %v44_v20  ;;  %v293_v33 = vcombine.low %v285_v21, %v292_v25  ;;  %v302_v34 = vrot.slane %v294_v26, %v508_v10  ;;  %v311_v35 = vcombine.low %v179_v23, %v183_v27 }
  0x3f   :  { %v309_v5 = vrot.slane %v295_v29, %v508_v10  ;;  %v312_v36 = vcombine.low %v187_v30, %v191_v31 }
  0x40   :  { %348 = vst [vmem:[#allocation7 + $0x20] sm:$0xff] %v340_v32  ;;  %v341_v37 = vadd.f32 %v293_v33, %v45_v28  ;;  %v319_v6 = vrot.slane %v311_v35, %v508_v10 }
  0x41   :  { %v310_v39 = vcombine.low %v302_v34, %v309_v5  ;;  %v326_v40 = vrot.slane %v312_v36, %v508_v10 }
  0x42   :  { %349 = vst [vmem:[#allocation7 + $0x28] sm:$0xff] %v341_v37 }
  0x43   :  { %v342_v8 = vadd.f32 %v310_v39, %v46_v38  ;;  %v327_v41 = vcombine.low %v319_v6, %v326_v40 }
  0x45   :  { %350 = vst [vmem:[#allocation7 + $0x30] sm:$0xff] %v342_v8  ;;  %v343_v42 = vadd.f32 %v327_v41, %v47_v7 }
  0x47   :  { %351 = vst [vmem:[#allocation7 + $0x38] sm:$0xff] %v343_v42 }
  0x48   :  { %433 = shalt.err (!%p430_p6)
}
  0x49   :  { %s434_s12 = scalar_lea.hbm %s575_s2, 1024 }
  0x4a   :  { %p435_p7 = scmp.ne.s32.totalorder %s575_s2, %s434_s12  ;;  %p438_p8 = scmp.lt.u32.totalorder %s434_s12, %s575_s2 }
  0x4c   :  { %p440_p9 = pnand %p438_p8, %p435_p7 }
  0x4e   :  { %443 = shalt.err (!%p440_p9)
}
  0x4f   :  { %363 = dma.vmem_to_hbm [thread:$0]  %s358_s8, 1024, %s575_s2, [#allocation4], %s451_s19, %s451_s19, %s452_s20  }
  0x50   :  { %448 = dma.done.wait [#allocation4], 1024  }
  0x51   :  { %449 = vsyncadd [#allocation4], 4294966272 }
  0x52   :  { %367 = vsyncpa [#allocation3], 1 }
  0x53   :  { %368 = vsyncpa [#allocation6], 1 }
  0x54   :  { %369 = vsyncpa [#allocation4], 1 }

</bundles_post_ra>
